<compile_context>
chip_gen: v7x
topology: tpu7x:2x2x1
jax: 0.10.0
libtpu: 0.0.40
codegen_flags: <defaults>
</compile_context>

<pallas_src>
import jax
import jax.numpy as jnp
from jax.experimental import pallas as pl
from jax.experimental.pallas import tpu as pltpu


# --------------------------------------------------------------------------- #
# Helpers                                                                     #
# --------------------------------------------------------------------------- #
def _round_up(x, m):
    return ((x + m - 1) // m) * m


def _sublane_multiple(dtype):
    return {4: 8, 2: 16, 1: 32}.get(jnp.dtype(dtype).itemsize, 8)


def _pick_vmem_limit_bytes():
    """Per-generation scoped-VMEM request (v5e/v6e: 128 MiB phys, v7x: 64 MiB)."""
    phys = None
    try:
        phys = getattr(pltpu.get_tpu_info(), "vmem_capacity_bytes", None)
    except Exception:
        phys = None
    if not phys or phys <= 0:
        phys = 64 * 1024 * 1024            # v7x-conservative fallback
    return int(min(phys * 7 // 10, 112 * 1024 * 1024))


def _choose_batch_tile(B):
    """Largest multiple-of-8 divisor of B (<=128); prefer >=2 blocks (v7x megacore)."""
    if B % 8 != 0:
        return B
    cands = [t for t in range(8, min(B, 128) + 1, 8) if B % t == 0]
    if not cands:
        return B
    multi = [t for t in cands if B // t >= 2]
    return max(multi) if multi else max(cands)


# --------------------------------------------------------------------------- #
# Kernel                                                                      #
# --------------------------------------------------------------------------- #
def _build_kernel(n_streams, stream_meta, total_tiles, init_val, C, pack_g):
    """stream_meta[k] = (n_tiles_k, tail_len_k); tail_len 0 means all tiles full."""

    def kernel(*refs):
        x_refs = refs[:n_streams]                       # each (TB, TS_k, C_eff)
        wa_ref, w_ref, b_ref = refs[n_streams:n_streams + 3]
        out_ref = refs[n_streams + 3]                   # (TB, OUT_PAD)
        pool_ref = refs[n_streams + 4]                  # (TB, C_eff) scratch

        t = pl.program_id(1)                            # sequence-tile index

        @pl.when(t == 0)
        def _init():
            pool_ref[...] = jnp.full(pool_ref.shape, init_val, pool_ref.dtype)

        # Fold each stream's current tile into the running max.  Streams whose
        # tiles ran out are skipped (their BlockSpec index is clamped so no new
        # DMA is issued); the ragged tail tile is folded via a static slice.
        for k in range(n_streams):
            n_k, tail_k = stream_meta[k]

            def _full_fold(k=k):
                pool_ref[...] = jnp.maximum(
                    pool_ref[...], jnp.max(x_refs[k][...], axis=1))

            def _tail_fold(k=k, tail_k=tail_k):
                blk = x_refs[k][:, :tail_k, :]          # edge tile: valid rows only
                pool_ref[...] = jnp.maximum(pool_ref[...], jnp.max(blk, axis=1))

            if tail_k == 0:
                if n_k == total_tiles:
                    _full_fold()
                else:
                    pl.when(t < n_k)(_full_fold)
            else:
                if n_k == 1:
                    pl.when(t == 0)(_tail_fold)
                else:
                    pl.when(t < n_k - 1)(_full_fold)
                    pl.when(t == n_k - 1)(_tail_fold)

        @pl.when(t == total_tiles - 1)
        def _epilogue():
            p = pool_ref[...]                           # (TB, C_eff)
            if pack_g > 1:                              # g-way segmented lane max
                pooled = p[:, :C]
                for i in range(1, pack_g):
                    pooled = jnp.maximum(pooled, p[:, i * C:(i + 1) * C])
            else:
                pooled = p
            pooled = pooled.astype(jnp.float32)         # (TB, C)

            # TODO(synk): LinearSelfAttention source not provided; implemented as
            # gate = softmax(pooled @ Wa^T), y = pooled * gate.
            scores = jnp.dot(pooled, wa_ref[...],
                             preferred_element_type=jnp.float32)        # (TB, C)
            scores = scores - jnp.max(scores, axis=-1, keepdims=True)
            e = jnp.exp(scores)
            gate = e / jnp.sum(e, axis=-1, keepdims=True)
            a = pooled * gate

            # LeakyReLU(0.2)
            a = jnp.where(a > 0, a, 0.2 * a)

            # Folded classifier (eval): single (TB, C) x (C, OUT_PAD) matmul.
            out = jnp.dot(a, w_ref[...],
                          preferred_element_type=jnp.float32) + b_ref[...]
            out_ref[...] = out.astype(out_ref.dtype)

    return kernel


# --------------------------------------------------------------------------- #
# Wrapper                                                                     #
# --------------------------------------------------------------------------- #
def maxpool_classifier(xs, wa, w1, b1, w2, b2, *, training=False,
                       max_seq_tile=2048, interpret=False):
    """xs: list (or dict) of (B, S_k, C) arrays. Returns (B, out_features) logits."""
    if training:
        # TODO(synk): training-mode Dropout(0.2) (and unfused classifier) not
        # implemented; this kernel assumes eval mode.
        raise NotImplementedError("maxpool_classifier: eval mode only")

    xs = list(xs.values()) if isinstance(xs, dict) else list(xs)
    n_streams = len(xs)
    B, _, C = xs[0].shape
    x_dtype = xs[0].dtype
    assert all(x.shape[0] == B and x.shape[2] == C for x in xs)

    out_f = w2.shape[0]
    out_pad = _round_up(out_f, 128)                     # lane-dense output width

    # --- one-time weight prep (no in-kernel transposes, classifier folded) ----
    wa_t = jnp.asarray(wa, jnp.float32).T                                  # (C, C)
    w_fold = jnp.asarray(w2, jnp.float32) @ jnp.asarray(w1, jnp.float32)   # (out, C)
    b_fold = (jnp.asarray(w2, jnp.float32) @ jnp.asarray(b1, jnp.float32)
              + jnp.asarray(b2, jnp.float32))                              # (out,)
    w_fold_t = jnp.zeros((C, out_pad), jnp.float32).at[:, :out_f].set(w_fold.T)
    b_fold_p = jnp.zeros((1, out_pad), jnp.float32).at[:, :out_f].set(b_fold[None, :])

    # --- lane packing: (B, S, C) -> (B, S/g, g*C) with g*C == 128 (free reshape) ---
    pack_g = 1
    if C < 128 and 128 % C == 0:
        g = 128 // C
        if all(x.shape[1] % g == 0 for x in xs):
            pack_g = g
    c_eff = pack_g * C
    xs_in = ([x.reshape(B, x.shape[1] // pack_g, c_eff) for x in xs]
             if pack_g > 1 else xs)

    if jnp.issubdtype(x_dtype, jnp.floating):
        init_val = -jnp.inf
    else:
        init_val = jnp.iinfo(x_dtype).min

    # --- batch tile: big per-step DMA, >=2 blocks when possible (v7x megacore) ----
    tb = _choose_batch_tile(B)
    n_btiles = B // tb

    # --- layout-aware VMEM budget -> sequence-tile cap -----------------------------
    itemsize = jnp.dtype(x_dtype).itemsize
    sub = _sublane_multiple(x_dtype)                    # dtype-aware sublane align
    lane_c = _round_up(c_eff, 128)                      # real lane footprint
    vmem_limit = _pick_vmem_limit_bytes()

    fixed = 2 * 4 * (_round_up(C, 8) * _round_up(C, 128)   # wa (worst case 2 bufs)
                     + _round_up(C, 8) * out_pad           # folded W
                     + 8 * out_pad)                        # folded bias
    fixed += 2 * 4 * _round_up(tb, 8) * out_pad            # output, double-buffered
    fixed += itemsize * _round_up(tb, 8) * lane_c          # running-max scratch
    budget = max(vmem_limit - fixed - (4 << 20), 1 << 20)

    bytes_per_seq_row = 2 * tb * lane_c * itemsize         # double-buffered streams
    ts_cap = budget // max(1, n_streams * bytes_per_seq_row)
    ts_cap = max(sub, (min(int(ts_cap), int(max_seq_tile)) // sub) * sub)

    # --- per-stream sequence tiling (cdiv grid, ragged tail handled in-kernel) ----
    seq_tile, stream_meta = [], []                      # ts_k, (n_tiles_k, tail_k)
    for x in xs_in:
        s_eff = x.shape[1]
        if s_eff <= ts_cap:
            ts_k, n_k, tail_k = s_eff, 1, 0
        else:
            ts_k = ts_cap
            n_k = (s_eff + ts_k - 1) // ts_k
            tail_k = s_eff % ts_k                       # 0 => all tiles full
        seq_tile.append(ts_k)
        stream_meta.append((n_k, tail_k))
    total_tiles = max(n for n, _ in stream_meta)

    kernel = _build_kernel(n_streams, stream_meta, total_tiles, init_val, C, pack_g)

    stream_specs = []
    for ts_k, (n_k, _) in zip(seq_tile, stream_meta):
        stream_specs.append(pl.BlockSpec(
            (tb, ts_k, c_eff),
            lambda b, t, last=n_k - 1: (b, jnp.minimum(t, last), 0)))

    out_spec = pl.BlockSpec((tb, out_pad), lambda b, t: (b, 0))

    def _run(single_buffer_weights):
        wspecs = []
        for shp in ((C, C), (C, out_pad), (1, out_pad)):
            if single_buffer_weights:
                wspecs.append(pl.BlockSpec(shp, lambda b, t: (0, 0),
                                           pipeline_mode=pl.Buffered(1)))
            else:
                wspecs.append(pl.BlockSpec(shp, lambda b, t: (0, 0)))
        return pl.pallas_call(
            kernel,
            out_shape=jax.ShapeDtypeStruct((B, out_pad), jnp.float32),
            grid_spec=pltpu.PrefetchScalarGridSpec(
                num_scalar_prefetch=0,
                grid=(n_btiles, total_tiles),
                in_specs=stream_specs + wspecs,
                out_specs=out_spec,
                scratch_shapes=[pltpu.VMEM((tb, c_eff), x_dtype)],
            ),
            compiler_params=pltpu.CompilerParams(
                dimension_semantics=("parallel", "arbitrary"),
                vmem_limit_bytes=vmem_limit),
            interpret=interpret,
        )(*xs_in, wa_t, w_fold_t, b_fold_p)

    try:
        out_padded = _run(True)       # constant-index weights single-buffered
    except Exception:
        out_padded = _run(False)      # fallback if Buffered(1)/pipeline_mode rejected

    return out_padded[:, :out_f]


# --------------------------------------------------------------------------- #
# Pure-JAX reference & setup helpers                                          #
# --------------------------------------------------------------------------- #
def _reference(xs, wa, w1, b1, w2, b2):
    x = jnp.concatenate(list(xs), axis=1)
    pooled = jnp.max(x, axis=1).astype(jnp.float32)
    gate = jax.nn.softmax(pooled @ wa.T, axis=-1)
    a = pooled * gate
    a = jnp.where(a > 0, a, 0.2 * a)
    h = a @ w1.T + b1
    return h @ w2.T + b2


def _linear_init(key, out_f, in_f, with_bias=True):
    # Deterministic PyTorch-style init: U(-1/sqrt(fan_in), 1/sqrt(fan_in)).
    bound = 1.0 / (in_f ** 0.5)
    kw, kb = jax.random.split(key)
    w = jax.random.uniform(kw, (out_f, in_f), jnp.float32, -bound, bound)
    if not with_bias:
        return w
    b = jax.random.uniform(kb, (out_f,), jnp.float32, -bound, bound)
    return w, b


if __name__ == "__main__":
    B = 2
    C = 32              # in_features
    out_features = 10
    reduction = 8
    hidden = C // reduction     # 4

    key = jax.random.PRNGKey(0)
    k_x0, k_x1, k_wa, k_l1, k_l2 = jax.random.split(key, 5)

    # Two modality streams with different sequence lengths.  Small max_seq_tile so
    # the multi-tile / unequal-tile-count / ragged-tail / lane-packing paths all run.
    x0 = jax.random.normal(k_x0, (B, 64, C), jnp.float32)   # packs to (B, 16, 128)
    x1 = jax.random.normal(k_x1, (B, 88, C), jnp.float32)   # packs to (B, 22, 128)

    # LinearSelfAttention weight (bias=False).
    wa = _linear_init(k_wa, C, C, with_bias=False)
    # SimpleClassifier: Linear(C, C//reduction) -> Dropout -> Linear(C//reduction, out)
    w1, b1 = _linear_init(k_l1, hidden, C)
    w2, b2 = _linear_init(k_l2, out_features, hidden)

    out = maxpool_classifier([x0, x1], wa, w1, b1, w2, b2, max_seq_tile=8)
    out = jax.block_until_ready(out)
    ref = _reference([x0, x1], wa, w1, b1, w2, b2)

    assert out.shape == (B, out_features)
    assert bool(jnp.all(jnp.isfinite(out)))
    assert jnp.allclose(out, ref, rtol=5e-2, atol=5e-2), \
        float(jnp.max(jnp.abs(out - ref)))
    print("KERNEL_OK")
</pallas_src>

<mosaic_0001>
module attributes {stable_mosaic.version = 11 : i64} {
  func.func @kernel(%arg0: i32, %arg1: i32, %arg2: memref<2x8x128xf32, #tpu.memory_space<vmem>>, %arg3: memref<2x8x128xf32, #tpu.memory_space<vmem>>, %arg4: memref<32x32xf32, #tpu.memory_space<vmem>>, %arg5: memref<32x128xf32, #tpu.memory_space<vmem>>, %arg6: memref<1x128xf32, #tpu.memory_space<vmem>>, %arg7: memref<2x128xf32, #tpu.memory_space<vmem>>, %arg8: memref<2x128xf32, #tpu.memory_space<vmem>>) attributes {dimension_semantics = [#tpu.dimension_semantics<parallel>, #tpu.dimension_semantics<arbitrary>], iteration_bounds = array<i64: 1, 3>, scalar_prefetch = 0 : i64, scratch_operands = 1 : i64, tpu.core_type = #tpu.core_type<tc>, window_params = [{transform_indices = @transform_0, window_bounds = array<i64: 2, 8, 128>}, {transform_indices = @transform_1, window_bounds = array<i64: 2, 8, 128>}, {pipeline_mode = #tpu.pipeline_mode<synchronous>, transform_indices = @transform_2, window_bounds = array<i64: 32, 32>}, {pipeline_mode = #tpu.pipeline_mode<synchronous>, transform_indices = @transform_3, window_bounds = array<i64: 32, 128>}, {pipeline_mode = #tpu.pipeline_mode<synchronous>, transform_indices = @transform_4, window_bounds = array<i64: 1, 128>}, {transform_indices = @transform_5, window_bounds = array<i64: 2, 128>}]} {
    %c0_i32 = arith.constant 0 : i32
    %0 = arith.cmpi eq, %arg1, %c0_i32 : i32
    %1 = arith.extui %0 : i1 to i32
    %c0_i32_0 = arith.constant 0 : i32
    %2 = arith.cmpi ne, %1, %c0_i32_0 : i32
    scf.if %2 {
      %cst = arith.constant 0xFF800000 : f32
      %15 = vector.broadcast %cst : f32 to vector<2x128xf32>
      %c0 = arith.constant 0 : index
      %c0_8 = arith.constant 0 : index
      %16 = vector.load %arg8[%c0, %c0_8] : memref<2x128xf32, #tpu.memory_space<vmem>>, vector<2x128xf32>
      tpu.vector_store %arg8[%c0, %c0_8], %15 {strides = array<i32>} : memref<2x128xf32, #tpu.memory_space<vmem>>, vector<2x128xf32>,
    } else {
    }
    %c2_i32 = arith.constant 2 : i32
    %3 = arith.cmpi slt, %arg1, %c2_i32 : i32
    %4 = arith.extui %3 : i1 to i32
    %c0_i32_1 = arith.constant 0 : i32
    %5 = arith.cmpi ne, %4, %c0_i32_1 : i32
    scf.if %5 {
      %c0 = arith.constant 0 : index
      %c0_8 = arith.constant 0 : index
      %15 = vector.load %arg8[%c0, %c0_8] : memref<2x128xf32, #tpu.memory_space<vmem>>, vector<2x128xf32>
      %c0_9 = arith.constant 0 : index
      %c0_10 = arith.constant 0 : index
      %c0_11 = arith.constant 0 : index
      %16 = vector.load %arg2[%c0_9, %c0_10, %c0_11] : memref<2x8x128xf32, #tpu.memory_space<vmem>>, vector<2x8x128xf32>
      %cst = arith.constant dense<0xFF800000> : vector<2x128xf32>
      %17 = vector.multi_reduction <maximumf>, %16, %cst [1] : vector<2x8x128xf32> to vector<2x128xf32>
      %18 = arith.maximumf %15, %17 : vector<2x128xf32>
      %c0_12 = arith.constant 0 : index
      %c0_13 = arith.constant 0 : index
      %19 = vector.load %arg8[%c0_12, %c0_13] : memref<2x128xf32, #tpu.memory_space<vmem>>, vector<2x128xf32>
      tpu.vector_store %arg8[%c0_12, %c0_13], %18 {strides = array<i32>} : memref<2x128xf32, #tpu.memory_space<vmem>>, vector<2x128xf32>,
    } else {
    }
    %c2_i32_2 = arith.constant 2 : i32
    %6 = arith.cmpi slt, %arg1, %c2_i32_2 : i32
    %7 = arith.extui %6 : i1 to i32
    %c0_i32_3 = arith.constant 0 : i32
    %8 = arith.cmpi ne, %7, %c0_i32_3 : i32
    scf.if %8 {
      %c0 = arith.constant 0 : index
      %c0_8 = arith.constant 0 : index
      %15 = vector.load %arg8[%c0, %c0_8] : memref<2x128xf32, #tpu.memory_space<vmem>>, vector<2x128xf32>
      %c0_9 = arith.constant 0 : index
      %c0_10 = arith.constant 0 : index
      %c0_11 = arith.constant 0 : index
      %16 = vector.load %arg3[%c0_9, %c0_10, %c0_11] : memref<2x8x128xf32, #tpu.memory_space<vmem>>, vector<2x8x128xf32>
      %cst = arith.constant dense<0xFF800000> : vector<2x128xf32>
      %17 = vector.multi_reduction <maximumf>, %16, %cst [1] : vector<2x8x128xf32> to vector<2x128xf32>
      %18 = arith.maximumf %15, %17 : vector<2x128xf32>
      %c0_12 = arith.constant 0 : index
      %c0_13 = arith.constant 0 : index
      %19 = vector.load %arg8[%c0_12, %c0_13] : memref<2x128xf32, #tpu.memory_space<vmem>>, vector<2x128xf32>
      tpu.vector_store %arg8[%c0_12, %c0_13], %18 {strides = array<i32>} : memref<2x128xf32, #tpu.memory_space<vmem>>, vector<2x128xf32>,
    } else {
    }
    %c2_i32_4 = arith.constant 2 : i32
    %9 = arith.cmpi eq, %arg1, %c2_i32_4 : i32
    %10 = arith.extui %9 : i1 to i32
    %c0_i32_5 = arith.constant 0 : i32
    %11 = arith.cmpi ne, %10, %c0_i32_5 : i32
    scf.if %11 {
      %c0 = arith.constant 0 : index
      %c0_8 = arith.constant 0 : index
      %c0_9 = arith.constant 0 : index
      %15 = vector.load %arg3[%c0, %c0_8, %c0_9] : memref<2x8x128xf32, #tpu.memory_space<vmem>>, vector<2x6x128xf32>
      %c0_10 = arith.constant 0 : index
      %c0_11 = arith.constant 0 : index
      %16 = vector.load %arg8[%c0_10, %c0_11] : memref<2x128xf32, #tpu.memory_space<vmem>>, vector<2x128xf32>
      %cst = arith.constant dense<0xFF800000> : vector<2x128xf32>
      %17 = vector.multi_reduction <maximumf>, %15, %cst [1] : vector<2x6x128xf32> to vector<2x128xf32>
      %18 = arith.maximumf %16, %17 : vector<2x128xf32>
      %c0_12 = arith.constant 0 : index
      %c0_13 = arith.constant 0 : index
      %19 = vector.load %arg8[%c0_12, %c0_13] : memref<2x128xf32, #tpu.memory_space<vmem>>, vector<2x128xf32>
      tpu.vector_store %arg8[%c0_12, %c0_13], %18 {strides = array<i32>} : memref<2x128xf32, #tpu.memory_space<vmem>>, vector<2x128xf32>,
    } else {
    }
    %c2_i32_6 = arith.constant 2 : i32
    %12 = arith.cmpi eq, %arg1, %c2_i32_6 : i32
    %13 = arith.extui %12 : i1 to i32
    %c0_i32_7 = arith.constant 0 : i32
    %14 = arith.cmpi ne, %13, %c0_i32_7 : i32
    scf.if %14 {
      %c0 = arith.constant 0 : index
      %c0_8 = arith.constant 0 : index
      %15 = vector.load %arg8[%c0, %c0_8] : memref<2x128xf32, #tpu.memory_space<vmem>>, vector<2x128xf32>
      %16 = vector.extract_strided_slice %15 {offsets = [0, 0], sizes = [2, 32], strides = [1, 1]} : vector<2x128xf32> to vector<2x32xf32>
      %17 = vector.extract_strided_slice %15 {offsets = [0, 32], sizes = [2, 32], strides = [1, 1]} : vector<2x128xf32> to vector<2x32xf32>
      %18 = arith.maximumf %16, %17 : vector<2x32xf32>
      %19 = vector.extract_strided_slice %15 {offsets = [0, 64], sizes = [2, 32], strides = [1, 1]} : vector<2x128xf32> to vector<2x32xf32>
      %20 = arith.maximumf %18, %19 : vector<2x32xf32>
      %21 = vector.extract_strided_slice %15 {offsets = [0, 96], sizes = [2, 32], strides = [1, 1]} : vector<2x128xf32> to vector<2x32xf32>
      %22 = arith.maximumf %20, %21 : vector<2x32xf32>
      %c0_9 = arith.constant 0 : index
      %c0_10 = arith.constant 0 : index
      %23 = vector.load %arg4[%c0_9, %c0_10] : memref<32x32xf32, #tpu.memory_space<vmem>>, vector<32x32xf32>
      %cst = arith.constant dense<0.000000e+00> : vector<2x32xf32>
      %24 = tpu.matmul %22, %23, %cst {dimension_numbers = #tpu.dot_dimension_numbers<[1], [0], [0], [1], [0, 0, 1, 1], [], []>} : vector<2x32xf32>, vector<32x32xf32>, vector<2x32xf32> -> vector<2x32xf32>
      %cst_11 = arith.constant dense<0xFF800000> : vector<2xf32>
      %25 = vector.multi_reduction <maximumf>, %24, %cst_11 [1] : vector<2x32xf32> to vector<2xf32>
      %26 = vector.shape_cast %25 : vector<2xf32> to vector<2x1xf32>
      %27 = vector.broadcast %26 : vector<2x1xf32> to vector<2x32xf32>
      %28 = arith.subf %24, %27 : vector<2x32xf32>
      %29 = math.exp %28 : vector<2x32xf32>
      %cst_12 = arith.constant dense<0.000000e+00> : vector<2xf32>
      %30 = vector.multi_reduction <add>, %29, %cst_12 [1] : vector<2x32xf32> to vector<2xf32>
      %31 = vector.shape_cast %30 : vector<2xf32> to vector<2x1xf32>
      %32 = vector.broadcast %31 : vector<2x1xf32> to vector<2x32xf32>
      %33 = arith.divf %29, %32 : vector<2x32xf32>
      %34 = arith.mulf %22, %33 : vector<2x32xf32>
      %cst_13 = arith.constant 0.000000e+00 : f32
      %35 = vector.broadcast %cst_13 : f32 to vector<2x32xf32>
      %36 = arith.cmpf ogt, %34, %35 : vector<2x32xf32>
      %cst_14 = arith.constant 2.000000e-01 : f32
      %37 = vector.broadcast %cst_14 : f32 to vector<2x32xf32>
      %38 = arith.mulf %37, %34 : vector<2x32xf32>
      %39 = arith.select %36, %34, %38 : vector<2x32xi1>, vector<2x32xf32>
      %c0_15 = arith.constant 0 : index
      %c0_16 = arith.constant 0 : index
      %40 = vector.load %arg5[%c0_15, %c0_16] : memref<32x128xf32, #tpu.memory_space<vmem>>, vector<32x128xf32>
      %cst_17 = arith.constant dense<0.000000e+00> : vector<2x128xf32>
      %41 = tpu.matmul %39, %40, %cst_17 {dimension_numbers = #tpu.dot_dimension_numbers<[1], [0], [0], [1], [0, 0, 1, 1], [], []>} : vector<2x32xf32>, vector<32x128xf32>, vector<2x128xf32> -> vector<2x128xf32>
      %c0_18 = arith.constant 0 : index
      %c0_19 = arith.constant 0 : index
      %42 = vector.load %arg6[%c0_18, %c0_19] : memref<1x128xf32, #tpu.memory_space<vmem>>, vector<1x128xf32>
      %43 = vector.broadcast %42 : vector<1x128xf32> to vector<2x128xf32>
      %44 = arith.addf %41, %43 : vector<2x128xf32>
      %c0_20 = arith.constant 0 : index
      %c0_21 = arith.constant 0 : index
      %45 = vector.load %arg7[%c0_20, %c0_21] : memref<2x128xf32, #tpu.memory_space<vmem>>, vector<2x128xf32>
      tpu.vector_store %arg7[%c0_20, %c0_21], %44 {strides = array<i32>} : memref<2x128xf32, #tpu.memory_space<vmem>>, vector<2x128xf32>,
    } else {
    }
    return
  }
  func.func @transform_0(%arg0: i32, %arg1: i32) -> (i32, i32, i32) {
    %c1_i32 = arith.constant 1 : i32
    %0 = arith.minsi %arg1, %c1_i32 : i32
    %c0_i32 = arith.constant 0 : i32
    %c0_i32_0 = arith.constant 0 : i32
    return %arg0, %0, %c0_i32 : i32, i32, i32
  }
  func.func @transform_1(%arg0: i32, %arg1: i32) -> (i32, i32, i32) {
    %c2_i32 = arith.constant 2 : i32
    %0 = arith.minsi %arg1, %c2_i32 : i32
    %c0_i32 = arith.constant 0 : i32
    %c0_i32_0 = arith.constant 0 : i32
    return %arg0, %0, %c0_i32 : i32, i32, i32
  }
  func.func @transform_2(%arg0: i32, %arg1: i32) -> (i32, i32) {
    %c0_i32 = arith.constant 0 : i32
    %c0_i32_0 = arith.constant 0 : i32
    %c0_i32_1 = arith.constant 0 : i32
    return %c0_i32, %c0_i32_0 : i32, i32
  }
  func.func @transform_3(%arg0: i32, %arg1: i32) -> (i32, i32) {
    %c0_i32 = arith.constant 0 : i32
    %c0_i32_0 = arith.constant 0 : i32
    %c0_i32_1 = arith.constant 0 : i32
    return %c0_i32, %c0_i32_0 : i32, i32
  }
  func.func @transform_4(%arg0: i32, %arg1: i32) -> (i32, i32) {
    %c0_i32 = arith.constant 0 : i32
    %c0_i32_0 = arith.constant 0 : i32
    %c0_i32_1 = arith.constant 0 : i32
    return %c0_i32, %c0_i32_0 : i32, i32
  }
  func.func @transform_5(%arg0: i32, %arg1: i32) -> (i32, i32) {
    %c0_i32 = arith.constant 0 : i32
    %c0_i32_0 = arith.constant 0 : i32
    return %arg0, %c0_i32 : i32, i32
  }
}

module attributes {stable_mosaic.version = 11 : i64} {
  func.func @kernel(%arg0: i32, %arg1: i32, %arg2: memref<2x8x128xf32, #tpu.memory_space<vmem>>, %arg3: memref<2x8x128xf32, #tpu.memory_space<vmem>>, %arg4: memref<32x32xf32, #tpu.memory_space<vmem>>, %arg5: memref<32x128xf32, #tpu.memory_space<vmem>>, %arg6: memref<1x128xf32, #tpu.memory_space<vmem>>, %arg7: memref<2x128xf32, #tpu.memory_space<vmem>>, %arg8: memref<2x128xf32, #tpu.memory_space<vmem>>) attributes {dimension_semantics = [#tpu.dimension_semantics<parallel>, #tpu.dimension_semantics<arbitrary>], iteration_bounds = array<i64: 1, 3>, scalar_prefetch = 0 : i64, scratch_operands = 1 : i64, tpu.core_type = #tpu.core_type<tc>, window_params = [{transform_indices = @transform_0, window_bounds = array<i64: 2, 8, 128>}, {transform_indices = @transform_1, window_bounds = array<i64: 2, 8, 128>}, {pipeline_mode = #tpu.pipeline_mode<synchronous>, transform_indices = @transform_2, window_bounds = array<i64: 32, 32>}, {pipeline_mode = #tpu.pipeline_mode<synchronous>, transform_indices = @transform_3, window_bounds = array<i64: 32, 128>}, {pipeline_mode = #tpu.pipeline_mode<synchronous>, transform_indices = @transform_4, window_bounds = array<i64: 1, 128>}, {transform_indices = @transform_5, window_bounds = array<i64: 2, 128>}]} {
    %c0_i32 = arith.constant 0 : i32
    %0 = arith.cmpi eq, %arg1, %c0_i32 : i32
    %1 = arith.extui %0 : i1 to i32
    %c0_i32_0 = arith.constant 0 : i32
    %2 = arith.cmpi ne, %1, %c0_i32_0 : i32
    scf.if %2 {
      %cst = arith.constant 0xFF800000 : f32
      %15 = vector.broadcast %cst : f32 to vector<2x128xf32>
      %c0 = arith.constant 0 : index
      %c0_8 = arith.constant 0 : index
      %16 = vector.load %arg8[%c0, %c0_8] : memref<2x128xf32, #tpu.memory_space<vmem>>, vector<2x128xf32>
      tpu.vector_store %arg8[%c0, %c0_8], %15 {strides = array<i32>} : memref<2x128xf32, #tpu.memory_space<vmem>>, vector<2x128xf32>,
    } else {
    }
    %c2_i32 = arith.constant 2 : i32
    %3 = arith.cmpi slt, %arg1, %c2_i32 : i32
    %4 = arith.extui %3 : i1 to i32
    %c0_i32_1 = arith.constant 0 : i32
    %5 = arith.cmpi ne, %4, %c0_i32_1 : i32
    scf.if %5 {
      %c0 = arith.constant 0 : index
      %c0_8 = arith.constant 0 : index
      %15 = vector.load %arg8[%c0, %c0_8] : memref<2x128xf32, #tpu.memory_space<vmem>>, vector<2x128xf32>
      %c0_9 = arith.constant 0 : index
      %c0_10 = arith.constant 0 : index
      %c0_11 = arith.constant 0 : index
      %16 = vector.load %arg2[%c0_9, %c0_10, %c0_11] : memref<2x8x128xf32, #tpu.memory_space<vmem>>, vector<2x8x128xf32>
      %cst = arith.constant dense<0xFF800000> : vector<2x128xf32>
      %17 = vector.multi_reduction <maximumf>, %16, %cst [1] : vector<2x8x128xf32> to vector<2x128xf32>
      %18 = arith.maximumf %15, %17 : vector<2x128xf32>
      %c0_12 = arith.constant 0 : index
      %c0_13 = arith.constant 0 : index
      %19 = vector.load %arg8[%c0_12, %c0_13] : memref<2x128xf32, #tpu.memory_space<vmem>>, vector<2x128xf32>
      tpu.vector_store %arg8[%c0_12, %c0_13], %18 {strides = array<i32>} : memref<2x128xf32, #tpu.memory_space<vmem>>, vector<2x128xf32>,
    } else {
    }
    %c2_i32_2 = arith.constant 2 : i32
    %6 = arith.cmpi slt, %arg1, %c2_i32_2 : i32
    %7 = arith.extui %6 : i1 to i32
    %c0_i32_3 = arith.constant 0 : i32
    %8 = arith.cmpi ne, %7, %c0_i32_3 : i32
    scf.if %8 {
      %c0 = arith.constant 0 : index
      %c0_8 = arith.constant 0 : index
      %15 = vector.load %arg8[%c0, %c0_8] : memref<2x128xf32, #tpu.memory_space<vmem>>, vector<2x128xf32>
      %c0_9 = arith.constant 0 : index
      %c0_10 = arith.constant 0 : index
      %c0_11 = arith.constant 0 : index
      %16 = vector.load %arg3[%c0_9, %c0_10, %c0_11] : memref<2x8x128xf32, #tpu.memory_space<vmem>>, vector<2x8x128xf32>
      %cst = arith.constant dense<0xFF800000> : vector<2x128xf32>
      %17 = vector.multi_reduction <maximumf>, %16, %cst [1] : vector<2x8x128xf32> to vector<2x128xf32>
      %18 = arith.maximumf %15, %17 : vector<2x128xf32>
      %c0_12 = arith.constant 0 : index
      %c0_13 = arith.constant 0 : index
      %19 = vector.load %arg8[%c0_12, %c0_13] : memref<2x128xf32, #tpu.memory_space<vmem>>, vector<2x128xf32>
      tpu.vector_store %arg8[%c0_12, %c0_13], %18 {strides = array<i32>} : memref<2x128xf32, #tpu.memory_space<vmem>>, vector<2x128xf32>,
    } else {
    }
    %c2_i32_4 = arith.constant 2 : i32
    %9 = arith.cmpi eq, %arg1, %c2_i32_4 : i32
    %10 = arith.extui %9 : i1 to i32
    %c0_i32_5 = arith.constant 0 : i32
    %11 = arith.cmpi ne, %10, %c0_i32_5 : i32
    scf.if %11 {
      %c0 = arith.constant 0 : index
      %c0_8 = arith.constant 0 : index
      %c0_9 = arith.constant 0 : index
      %15 = vector.load %arg3[%c0, %c0_8, %c0_9] : memref<2x8x128xf32, #tpu.memory_space<vmem>>, vector<2x6x128xf32>
      %c0_10 = arith.constant 0 : index
      %c0_11 = arith.constant 0 : index
      %16 = vector.load %arg8[%c0_10, %c0_11] : memref<2x128xf32, #tpu.memory_space<vmem>>, vector<2x128xf32>
      %cst = arith.constant dense<0xFF800000> : vector<2x128xf32>
      %17 = vector.multi_reduction <maximumf>, %15, %cst [1] : vector<2x6x128xf32> to vector<2x128xf32>
      %18 = arith.maximumf %16, %17 : vector<2x128xf32>
      %c0_12 = arith.constant 0 : index
      %c0_13 = arith.constant 0 : index
      %19 = vector.load %arg8[%c0_12, %c0_13] : memref<2x128xf32, #tpu.memory_space<vmem>>, vector<2x128xf32>
      tpu.vector_store %arg8[%c0_12, %c0_13], %18 {strides = array<i32>} : memref<2x128xf32, #tpu.memory_space<vmem>>, vector<2x128xf32>,
    } else {
    }
    %c2_i32_6 = arith.constant 2 : i32
    %12 = arith.cmpi eq, %arg1, %c2_i32_6 : i32
    %13 = arith.extui %12 : i1 to i32
    %c0_i32_7 = arith.constant 0 : i32
    %14 = arith.cmpi ne, %13, %c0_i32_7 : i32
    scf.if %14 {
      %c0 = arith.constant 0 : index
      %c0_8 = arith.constant 0 : index
      %15 = vector.load %arg8[%c0, %c0_8] : memref<2x128xf32, #tpu.memory_space<vmem>>, vector<2x128xf32>
      %16 = vector.extract_strided_slice %15 {offsets = [0, 0], sizes = [2, 32], strides = [1, 1]} : vector<2x128xf32> to vector<2x32xf32>
      %17 = vector.extract_strided_slice %15 {offsets = [0, 32], sizes = [2, 32], strides = [1, 1]} : vector<2x128xf32> to vector<2x32xf32>
      %18 = arith.maximumf %16, %17 : vector<2x32xf32>
      %19 = vector.extract_strided_slice %15 {offsets = [0, 64], sizes = [2, 32], strides = [1, 1]} : vector<2x128xf32> to vector<2x32xf32>
      %20 = arith.maximumf %18, %19 : vector<2x32xf32>
      %21 = vector.extract_strided_slice %15 {offsets = [0, 96], sizes = [2, 32], strides = [1, 1]} : vector<2x128xf32> to vector<2x32xf32>
      %22 = arith.maximumf %20, %21 : vector<2x32xf32>
      %c0_9 = arith.constant 0 : index
      %c0_10 = arith.constant 0 : index
      %23 = vector.load %arg4[%c0_9, %c0_10] : memref<32x32xf32, #tpu.memory_space<vmem>>, vector<32x32xf32>
      %cst = arith.constant dense<0.000000e+00> : vector<2x32xf32>
      %24 = tpu.matmul %22, %23, %cst {dimension_numbers = #tpu.dot_dimension_numbers<[1], [0], [0], [1], [0, 0, 1, 1], [], []>} : vector<2x32xf32>, vector<32x32xf32>, vector<2x32xf32> -> vector<2x32xf32>
      %cst_11 = arith.constant dense<0xFF800000> : vector<2xf32>
      %25 = vector.multi_reduction <maximumf>, %24, %cst_11 [1] : vector<2x32xf32> to vector<2xf32>
      %26 = vector.shape_cast %25 : vector<2xf32> to vector<2x1xf32>
      %27 = vector.broadcast %26 : vector<2x1xf32> to vector<2x32xf32>
      %28 = arith.subf %24, %27 : vector<2x32xf32>
      %29 = math.exp %28 : vector<2x32xf32>
      %cst_12 = arith.constant dense<0.000000e+00> : vector<2xf32>
      %30 = vector.multi_reduction <add>, %29, %cst_12 [1] : vector<2x32xf32> to vector<2xf32>
      %31 = vector.shape_cast %30 : vector<2xf32> to vector<2x1xf32>
      %32 = vector.broadcast %31 : vector<2x1xf32> to vector<2x32xf32>
      %33 = arith.divf %29, %32 : vector<2x32xf32>
      %34 = arith.mulf %22, %33 : vector<2x32xf32>
      %cst_13 = arith.constant 0.000000e+00 : f32
      %35 = vector.broadcast %cst_13 : f32 to vector<2x32xf32>
      %36 = arith.cmpf ogt, %34, %35 : vector<2x32xf32>
      %cst_14 = arith.constant 2.000000e-01 : f32
      %37 = vector.broadcast %cst_14 : f32 to vector<2x32xf32>
      %38 = arith.mulf %37, %34 : vector<2x32xf32>
      %39 = arith.select %36, %34, %38 : vector<2x32xi1>, vector<2x32xf32>
      %c0_15 = arith.constant 0 : index
      %c0_16 = arith.constant 0 : index
      %40 = vector.load %arg5[%c0_15, %c0_16] : memref<32x128xf32, #tpu.memory_space<vmem>>, vector<32x128xf32>
      %cst_17 = arith.constant dense<0.000000e+00> : vector<2x128xf32>
      %41 = tpu.matmul %39, %40, %cst_17 {dimension_numbers = #tpu.dot_dimension_numbers<[1], [0], [0], [1], [0, 0, 1, 1], [], []>} : vector<2x32xf32>, vector<32x128xf32>, vector<2x128xf32> -> vector<2x128xf32>
      %c0_18 = arith.constant 0 : index
      %c0_19 = arith.constant 0 : index
      %42 = vector.load %arg6[%c0_18, %c0_19] : memref<1x128xf32, #tpu.memory_space<vmem>>, vector<1x128xf32>
      %43 = vector.broadcast %42 : vector<1x128xf32> to vector<2x128xf32>
      %44 = arith.addf %41, %43 : vector<2x128xf32>
      %c0_20 = arith.constant 0 : index
      %c0_21 = arith.constant 0 : index
      %45 = vector.load %arg7[%c0_20, %c0_21] : memref<2x128xf32, #tpu.memory_space<vmem>>, vector<2x128xf32>
      tpu.vector_store %arg7[%c0_20, %c0_21], %44 {strides = array<i32>} : memref<2x128xf32, #tpu.memory_space<vmem>>, vector<2x128xf32>,
    } else {
    }
    return
  }
  func.func @transform_0(%arg0: i32, %arg1: i32) -> (i32, i32, i32) {
    %c1_i32 = arith.constant 1 : i32
    %0 = arith.minsi %arg1, %c1_i32 : i32
    %c0_i32 = arith.constant 0 : i32
    %c0_i32_0 = arith.constant 0 : i32
    return %arg0, %0, %c0_i32 : i32, i32, i32
  }
  func.func @transform_1(%arg0: i32, %arg1: i32) -> (i32, i32, i32) {
    %c2_i32 = arith.constant 2 : i32
    %0 = arith.minsi %arg1, %c2_i32 : i32
    %c0_i32 = arith.constant 0 : i32
    %c0_i32_0 = arith.constant 0 : i32
    return %arg0, %0, %c0_i32 : i32, i32, i32
  }
  func.func @transform_2(%arg0: i32, %arg1: i32) -> (i32, i32) {
    %c0_i32 = arith.constant 0 : i32
    %c0_i32_0 = arith.constant 0 : i32
    %c0_i32_1 = arith.constant 0 : i32
    return %c0_i32, %c0_i32_0 : i32, i32
  }
  func.func @transform_3(%arg0: i32, %arg1: i32) -> (i32, i32) {
    %c0_i32 = arith.constant 0 : i32
    %c0_i32_0 = arith.constant 0 : i32
    %c0_i32_1 = arith.constant 0 : i32
    return %c0_i32, %c0_i32_0 : i32, i32
  }
  func.func @transform_4(%arg0: i32, %arg1: i32) -> (i32, i32) {
    %c0_i32 = arith.constant 0 : i32
    %c0_i32_0 = arith.constant 0 : i32
    %c0_i32_1 = arith.constant 0 : i32
    return %c0_i32, %c0_i32_0 : i32, i32
  }
  func.func @transform_5(%arg0: i32, %arg1: i32) -> (i32, i32) {
    %c0_i32 = arith.constant 0 : i32
    %c0_i32_0 = arith.constant 0 : i32
    return %arg0, %c0_i32 : i32, i32
  }
}

</mosaic_0001>

<bundles_post_ra>
// kernel: tpu_custom_call.1
= control target key start
LH: loop header
LB: loop body
LE: loop exit
PB: predicated region body
PF: predicated region fallthrough
CT: control target
= control target key end

     0   :  { %10 = vsyncpa [#allocation6], 0  ;;  %s975_s18 = smov 0   ;;  %s977_s19 = smov 0   ;;  %s1147_s0 = inlined_call_operand.vmem [shape: f32[2,16,128], index: 0, kind: input, shape index: {}]   ;;  %s1148_s1 = inlined_call_operand.vmem [shape: f32[2,22,128], index: 1, kind: input, shape index: {}]   ;;  %s1149_s2 = inlined_call_operand.vmem [shape: f32[32,32], index: 2, kind: input, shape index: {}]   ;;  %s1150_s3 = inlined_call_operand.vmem [shape: f32[32,128], index: 3, kind: input, shape index: {}]   ;;  %s1151_s4 = inlined_call_operand.vmem [shape: f32[1,128], index: 4, kind: input, shape index: {}]   ;;  %s1152_s5 = inlined_call_operand.hbm [shape: f32[2,128], index: 5, kind: output, shape index: {}]  }
   0x1   :  { %s979_s20 = smov 0   ;;  %s981_s21 = smov 0  }
   0x2   :  { %s983_s22 = smov 0   ;;  %s985_s23 = smov 0  }
   0x3   :  { %s987_s24 = smov 0  }
   0x4 LB: > { %s713_s25 = sadd.s32 4294967295, %s935_s24   ;;  %s25_s26 = sadd.s32 1, %s931_s23  ;;  %s935_s24 = sphi %s987_s24, %s16_s24   ;;  %s931_s23 = sphi %s985_s23, %s1161_s23   ;;  %s927_s22 = sphi %s983_s22, %s1160_s22   ;;  %s923_s21 = sphi %s981_s21, %s1159_s21   ;;  %s919_s20 = sphi %s979_s20, %s1158_s20   ;;  %s915_s19 = sphi %s977_s19, %s1157_s19   ;;  %s911_s18 = sphi %s975_s18, %s1156_s18  }
   0x5   : > { %p26_p0 = scmp.ge.s32.totalorder %s25_s26, 3  ;;  %p32_p1 = scmp.lt.s32.totalorder %s931_s23, 1 }
   0x6   : > { %p48_p2 = scmp.ne.s32.totalorder %s923_s21, %s919_s20  ;;  %p49_p4 = scmp.eq.s32.totalorder %s935_s24, 0 }
   0x7   : > { %s1163_s26 = smov (%p26_p0, %s25_s26), 0  ;;  %p64_p5 = scmp.lt.s32.totalorder %s931_s23, 2 }
   0x8   : > { %s33_s27 = scalar_select %p32_p1, %s931_s23, 1 }
   0x9   : > { %p34_p3 = scmp.lt.s32.totalorder %s1163_s26, 1  ;;  %s41_s29 = sadd.s32 1, %s923_s21 }
   0xa   : > { %p1023_p6 = por %p49_p4, %p48_p2  ;;  %p66_p7 = scmp.lt.s32.totalorder %s1163_s26, 2 }
   0xb   : > { %s35_s28 = scalar_select %p34_p3, %s1163_s26, 1 }
   0xc   : > { %p80_p9 = scmp.ne.s32.totalorder %s915_s19, %s911_s18  ;;  %s73_s12 = sadd.s32 1, %s915_s19 }
   0xd   : > { %s37_s6 = ssub.s32 %s33_s27, %s35_s28  ;;  %p715_p12 = scmp.ge.s32.totalorder %s935_s24, 3 }
   0xe   : > { %p39_p8 = scmp.eq.s32.totalorder %s37_s6, 0  ;;  %p1035_p10 = por %p80_p9, %p49_p4 }
   0xf   : > { %s65_s7 = scalar_select %p64_p5, %s931_s23, 2 }
  0x10   : > { %s1032_s8 = scalar_select %p39_p8, %s923_s21, %s41_s29  }
  0x11   : > { %s67_s9 = scalar_select %p66_p7, %s1163_s26, 2 }
  0x12   : > { %204 = sbr.rel (%p715_p12) target bundleno = 39 (0x27), region = 28 }
  0x13   : > { %s69_s11 = ssub.s32 %s65_s7, %s67_s9 }
  0x14   : > { %p71_p11 = scmp.eq.s32.totalorder %s69_s11, 0 }
  0x16   : > { %s1041_s13 = scalar_select %p71_p11, %s915_s19, %s73_s12  }
  0x19   : > { %207 = sbr.rel (!%p1023_p6) target bundleno = 32 (0x20), region = 32  ;;  %s209_s14 = sand.u32 (%p1023_p6), 1, %s923_s21  }
  0x1a   : > { %s717_s15 = sshll.u32 (%p1023_p6), %s33_s27, 3  ;;  %s716_s16 = sshll.u32 (%p1023_p6), %s209_s14, 4 }
  0x1b   : > { %s218_s29 = scalar_lea.vmem (%p1023_p6), %s1147_s0, %s717_s15  ;;  %s211_s6 = scalar_lea.vmem (%p1023_p6), [#allocation3], %s716_s16 }
  0x1c   : > { %v248_v0 = vld [vmem:[%s218_s29] sm:$0xff] (%p1023_p6)  ;;  %v250_v1 = vld [vmem:[%s218_s29 + $0x10] sm:$0xff] (%p1023_p6) }
  0x1d   : > { %249 = vst [vmem:[%s211_s6] sm:$0xff] (%p1023_p6), %v248_v0  ;;  %251 = vst [vmem:[%s211_s6 + $0x8] sm:$0xff] (%p1023_p6), %v250_v1 }
  0x20 PF: > { %257 = sbr.rel (!%p1035_p10) target bundleno = 39 (0x27), region = 70  ;;  %s259_s30 = sand.u32 (%p1035_p10), 1, %s915_s19  }
  0x21   : > { %s719_s9 = sshll.u32 (%p1035_p10), %s65_s7, 3  ;;  %s718_s11 = sshll.u32 (%p1035_p10), %s259_s30, 4 }
  0x22   : > { %s268_s14 = scalar_lea.vmem (%p1035_p10), %s1148_s1, %s719_s9  ;;  %s261_s15 = scalar_lea.vmem (%p1035_p10), [#allocation4], %s718_s11 }
  0x23   : > { %v298_v2 = vld [vmem:[%s268_s14] sm:$0xff] (%p1035_p10)  ;;  %v300_v3 = vld [vmem:[%s268_s14 + $0x18] sm:$0xff] (%p1035_p10) }
  0x24   : > { %299 = vst [vmem:[%s261_s15] sm:$0xff] (%p1035_p10), %v298_v2  ;;  %301 = vst [vmem:[%s261_s15 + $0x8] sm:$0xff] (%p1035_p10), %v300_v3 }
  0x27 PF: > { %p720_p13 = scmp.ge.s32.totalorder %s935_s24, 1  ;;  %p306_p0 = scmp.lt.s32.totalorder %s935_s24, 4 }
  0x29   : > { %p307_p1 = pnand %p720_p13, %p306_p0 }
  0x2a   : > { %s313_s7 = sand.u32 (!%p307_p1), 1, %s919_s20   ;;  %s320_s10 = sand.u32 (!%p307_p1), 1, %s911_s18  }
  0x2b   : > { %310 = sbr.rel (%p307_p1) target bundleno = 1005 (0x3ed), region = 108  ;;  %s721_s16 = sshll.u32 (!%p307_p1), %s313_s7, 4 }
  0x2c   : > { %s722_s17 = sshll.u32 (!%p307_p1), %s320_s10, 4  ;;  %s315_s28 = scalar_lea.vmem (!%p307_p1), [#allocation3], %s721_s16 }
  0x2d   : > { %s1060_s29 = scalar_lea.vmem (!%p307_p1), [#allocation4], %s722_s17  ;;  %p723_p2 = scmp.ne.s32.totalorder (!%p307_p1), %s927_s22, 0 }
  0x32   : > { %355 = sbr.rel (%p723_p2) target bundleno = 57 (0x39), region = 120  ;;  %v937_v4 = vmov (!%p723_p2), -inf  }
  0x33   : > { %356 = vst [vmem:[#allocation2] sm:$0x3] (!%p723_p2), %v937_v4 }
  0x39 PF: > { %p724_p3 = scmp.ge.s32.totalorder %s927_s22, 2 }
  0x3a   : > { %v362_v5 = vld [vmem:[%s315_s28] sm:$0xff] (!%p724_p3)  ;;  %v363_v6 = vld [vmem:[%s315_s28 + $0x8] sm:$0xff] (!%p724_p3)  ;;  %vm378_vm0 = vcmask (!%p724_p3), 1041409  }
  0x3b   : > { %360 = sbr.rel (%p724_p3) target bundleno = 85 (0x55), region = 124  ;;  %v364_v7 = vrot.slane (!%p724_p3), %v362_v5, 4  ;;  %v370_v8 = vrot.slane (!%p724_p3), %v363_v6, 4  ;;  %v384_v9 = vld [vmem:[%s1060_s29] sm:$0xff] (!%p724_p3)  ;;  %v385_v10 = vld [vmem:[%s1060_s29 + $0x8] sm:$0xff] (!%p724_p3) }
  0x3c   : > { %v386_v11 = vrot.slane (!%p724_p3), %v384_v9, 4  ;;  %v392_v12 = vrot.slane (!%p724_p3), %v385_v10, 4  ;;  %v361_v27 = vld [vmem:[#allocation2] sm:$0x3] (!%p724_p3) }
  0x3d   : > { %v365_v13 = vmax.f32 (!%p724_p3), %v362_v5, %v364_v7  ;;  %v371_v14 = vmax.f32 (!%p724_p3), %v363_v6, %v370_v8 }
  0x3e   : > { %v387_v15 = vmax.f32 (!%p724_p3), %v384_v9, %v386_v11  ;;  %v393_v16 = vmax.f32 (!%p724_p3), %v385_v10, %v392_v12 }
  0x3f   : > { %v366_v17 = vrot.slane (!%p724_p3), %v365_v13, 2  ;;  %v372_v18 = vrot.slane (!%p724_p3), %v371_v14, 2 }
  0x40   : > { %v388_v19 = vrot.slane (!%p724_p3), %v387_v15, 2  ;;  %v394_v20 = vrot.slane (!%p724_p3), %v393_v16, 2 }
  0x41   : > { %v367_v21 = vmax.f32 (!%p724_p3), %v365_v13, %v366_v17  ;;  %v373_v22 = vmax.f32 (!%p724_p3), %v371_v14, %v372_v18 }
  0x42   : > { %v389_v25 = vmax.f32 %v387_v15, %v388_v19  ;;  %v395_v26 = vmax.f32 %v393_v16, %v394_v20 }
  0x43   : > { %v368_v23 = vrot.slane %v367_v21, 1  ;;  %v374_v24 = vrot.slane %v373_v22, 1 }
  0x44   : > { %v390_v31 = vrot.slane %v389_v25, 1  ;;  %v396_v32 = vrot.slane %v395_v26, 1 }
  0x45   : > { %v369_v28 = vmax.f32 %v367_v21, %v368_v23  ;;  %v375_v29 = vmax.f32 %v373_v22, %v374_v24 }
  0x46   : > { %v391_v34 = vmax.f32 %v389_v25, %v390_v31  ;;  %v397_v35 = vmax.f32 %v395_v26, %v396_v32 }
  0x47   : > { %v379_v30 = vsel %vm378_vm0, %v375_v29, %v369_v28 }
  0x48   : > { %v381_v33 = vmax.f32 %v361_v27, %v379_v30  ;;  %v400_v36 = vsel %vm378_vm0, %v397_v35, %v391_v34 }
  0x4a   : > { %382 = vst [vmem:[#allocation2] sm:$0x3] %v381_v33 }
  0x51   : > { %v383_v37 = vld [vmem:[#allocation2] sm:$0x3] }
  0x52   : > { %v402_v38 = vmax.f32 %v383_v37, %v400_v36 }
  0x54   : > { %403 = vst [vmem:[#allocation2] sm:$0x3] %v402_v38 }
  0x55 PF: > { %p725_p4 = scmp.ne.s32.totalorder %s927_s22, 2 }
  0x56   : > { %v408_v39 = vld [vmem:[%s1060_s29] sm:$0x3f] (!%p725_p4)  ;;  %v409_v40 = vld [vmem:[%s1060_s29 + $0x8] sm:$0x3f] (!%p725_p4)  ;;  %vm411_vm1 = vcmask (!%p725_p4), 1045504   ;;  %vm428_vm2 = vcmask (!%p725_p4), 1041409  }
  0x57   : > { %407 = sbr.rel (%p725_p4) target bundleno = 980 (0x3d4), region = 128  ;;  %v412_v41 = vsel (!%p725_p4), %vm411_vm1, %v408_v39, -inf  ;;  %v419_v42 = vsel (!%p725_p4), %vm411_vm1, %v409_v40, -inf  ;;  %v447_v53 = vld [vmem:[%s1149_s2] sm:$0xff] (!%p725_p4)  ;;  %v448_v54 = vld [vmem:[%s1149_s2 + $0x8] sm:$0xff] (!%p725_p4)  ;;  %v938_v59 = vmov (!%p725_p4), 0.0|0.0  }
  0x58   : > { %v413_v43 = vrot.slane (!%p725_p4), %v412_v41, 4  ;;  %v420_v44 = vrot.slane (!%p725_p4), %v419_v42, 4  ;;  %v766_v55 = vpack.c.bf16 (!%p725_p4), %v448_v54, %v447_v53  ;;  %765 = vmatprep.subr.bf16.mxu0 (!%p725_p4), %v938_v59  ;;  %771 = vmatprep.subr.bf16.mxu1 (!%p725_p4), %v938_v59  ;;  %v449_v61 = vld [vmem:[%s1149_s2 + $0x10] sm:$0xff] (!%p725_p4)  ;;  %v450_v62 = vld [vmem:[%s1149_s2 + $0x18] sm:$0xff] (!%p725_p4)  ;;  %vm939_vm3 = vmmov (!%p725_p4), 0   ;;  %s941_s27 = smov (!%p725_p4), 96  }
  0x59   : > { %v769_v0 = vpack.c.bf16 (!%p725_p4), %v450_v62, %v449_v61  ;;  %v940_v1 = vmov (!%p725_p4), 0.0   ;;  %s942_s14 = smov (!%p725_p4), 32   ;;  %s943_s15 = smov (!%p725_p4), 64   ;;  %vm451_vm4 = vcmask (!%p725_p4), 261120   ;;  %vm525_vm5 = vcmask (!%p725_p4), 254976   ;;  %v541_v17 = vld [vmem:[%s1150_s3] sm:$0xff] (!%p725_p4) }
  0x5a   : > { %v414_v45 = vmax.f32 (!%p725_p4), %v412_v41, %v413_v43  ;;  %v421_v46 = vmax.f32 (!%p725_p4), %v419_v42, %v420_v44  ;;  %767 = vmatpush3.bf16.msra.mxu0 (!%p725_p4), %v766_v55  ;;  %751 = vmatprep.mubr.msk.f32.mxu0 (!%p725_p4), %vm939_vm3, %v940_v1  ;;  %v542_v18 = vld [vmem:[%s1150_s3 + $0x8] sm:$0xff] (!%p725_p4)  ;;  %v543_v19 = vld [vmem:[%s1150_s3 + $0x10] sm:$0xff] (!%p725_p4)  ;;  %v544_v21 = vld [vmem:[%s1150_s3 + $0x18] sm:$0xff] (!%p725_p4) }
  0x5b   : > { %v410_v56 = vld [vmem:[#allocation2] sm:$0x3] (!%p725_p4)  ;;  %768 = vmatprep.subr.bf16.mxu0 (!%p725_p4), %v938_v59  ;;  %762 = vmatprep.mubr.msk.f32.mxu1 (!%p725_p4), %vm939_vm3, %v940_v1  ;;  %v772_v20 = vpack.c.bf16 (!%p725_p4), %v542_v18, %v541_v17  ;;  %v775_v22 = vpack.c.bf16 (!%p725_p4), %v544_v21, %v543_v19 }
  0x5c   : > { %v415_v47 = vrot.slane (!%p725_p4), %v414_v45, 2  ;;  %v422_v48 = vrot.slane (!%p725_p4), %v421_v46, 2  ;;  %v727_v29 = vld [vmem:[%s1151_s4] ss:$0 sm:$0xff] (!%p725_p4) }
  0x5d   : > { %773 = vmatpush3.bf16.msra.mxu1 (!%p725_p4), %v772_v20 }
  0x5e   : > { %v416_v49 = vmax.f32 %v414_v45, %v415_v47  ;;  %v423_v50 = vmax.f32 %v421_v46, %v422_v48  ;;  %770 = vmatpush3.bf16.msra.mxu0 %v769_v0  ;;  %774 = vmatprep.subr.bf16.mxu1 %v938_v59 }
  0x60   : > { %v417_v51 = vrot.slane %v416_v49, 1  ;;  %v424_v52 = vrot.slane %v423_v50, 1 }
  0x61   : > { %776 = vmatpush3.bf16.msra.mxu1 %v775_v22 }
  0x62   : > { %v418_v57 = vmax.f32 %v416_v49, %v417_v51  ;;  %v425_v58 = vmax.f32 %v423_v50, %v424_v52 }
  0x64   : > { %v429_v60 = vsel %vm428_vm2, %v425_v58, %v418_v57 }
  0x65   : > { %v431_v63 = vmax.f32 %v410_v56, %v429_v60 }
  0x67   : > { %432 = vst [vmem:[#allocation2] sm:$0x3] %v431_v63 }
  0x6e   : > { %v433_v2 = vld [vmem:[#allocation2] sm:$0x3] }
  0x6f   : > { %435 = vrot.lane.b32.xlu0 %v433_v2, %s941_s27  ;;  %443 = vrot.lane.b32.xlu1 %v433_v2, %s942_s14 }
  0x73   : > { %439 = vrot.lane.b32.xlu0 %v433_v2, %s943_s15 }
  0xe1   : > { %v436_v3 = vpop.permute.xlu0 %435  ;;  %v444_v6 = vpop.permute.xlu1 %443 }
  0xe2   : > { %v438_v4 = vmax.f32 %v433_v2, %v436_v3 }
  0xe5   : > { %v440_v5 = vpop.permute.xlu0 %439 }
  0xe6   : > { %v442_v7 = vmax.f32 %v438_v4, %v440_v5 }
  0xe8   : > { %v446_v8 = vmax.f32 %v442_v7, %v444_v6 }
  0xea   : > { %752 = vmatmul.mubr.msk.f32.vlgmr.msra.gmra.mrb[0].mxu0 %vm451_vm4, %v446_v8 }
 0x1bd   : > { %v521_v9 = vpop.f32.mrb[0].mxu0 }
 0x1be   : > { %v753_v10 = vpop.f32.mrb[1].mxu0  ;;  %v526_v11 = vsel %vm525_vm5, %v521_v9, -inf }
 0x1bf   : > { %527 = vmax.xlane.f32.xlu1 %v526_v11 }
 0x24c   : > { %v528_v12 = vpop.xlane.xlu1 %527 }
 0x24d   : > { %v529_v13 = vsub.f32 %v521_v9, %v528_v12 }
 0x24f   : > { %v530_v14 = vmul.f32 1.442695, %v529_v13 }
 0x251   : > { %847 = vpow2.f32 %v530_v14 }
 0x25b   : > { %v848_v15 = vpop.eup %847 }
 0x25c   : > { %v532_v16 = vsel %vm525_vm5, %v848_v15, 0.0 }
 0x25d   : > { %533 = vadd.xlane.f32.xlu0 %v532_v16 }
 0x2ea   : > { %v534_v23 = vpop.xlane.xlu0 %533 }
 0x2eb   : > { %849 = vrcp.f32 %v534_v23 }
 0x2f5   : > { %v850_v24 = vpop.eup %849 }
 0x2f6   : > { %v536_v25 = vmul.f32 %v850_v24, %v848_v15 }
 0x2f8   : > { %v537_v26 = vmul.f32 %v536_v25, %v446_v8 }
 0x2fa   : > { %vm538_vm6 = vcmp.gt.f32.partialorder %v537_v26, 0.0  ;;  %v539_v27 = vmul.f32 0.2, %v537_v26 }
 0x2fc   : > { %v540_v28 = vsel %vm538_vm6, %v537_v26, %v539_v27 }
 0x2fd   : > { %763 = vmatmul.mubr.msk.f32.vlgmr.msra.gmra.mrb[0].mxu1 %vm451_vm4, %v540_v28 }
 0x3d0   : > { %v621_v30 = vpop.f32.mrb[0].mxu1 }
 0x3d1   : > { %v622_v31 = vadd.f32 %v727_v29, %v621_v30  ;;  %v764_v32 = vpop.f32.mrb[1].mxu1 }
 0x3d3   : > { %625 = vst [vmem:[#allocation5] sm:$0x3] %v622_v31 }
 0x3d4 PF: > { %p1100_p5 = scmp.eq.s32.totalorder %s713_s25, 2  ;;  %s944_s9 = smov [#allocation5]  }
 0x3d5   : > { %s635_s11 = sshll.u32 %s944_s9, 4  ;;  %s636_s11 = int_to_ptr.vmem [resolvable:$true] %s635_s11 }
 0x3d6   : > { %s851_s12 = scalar_lea.vmem %s636_s11, 32  ;;  %p858_p9 = scmp.lt.s32.totalorder %s636_s11, %s636_s11 }
 0x3d7   : > { %p852_p6 = scmp.ne.s32.totalorder %s636_s11, %s851_s12  ;;  %p859_p10 = scmp.lt.s32.totalorder %s851_s12, %s851_s12 }
 0x3d9   : > { %p853_p7 = pnand %p852_p6, %p1100_p5  ;;  %p860_p11 = por %p859_p10, %p858_p9 }
 0x3db   : > { %p854_p8 = pneg %p853_p7 }
 0x3dd   : > { %p861_p12 = pnand %p860_p11, %p854_p8 }
 0x3df   : > { %864 = shalt.err (!%p861_p12)
}
 0x3e0   : > { %s865_s25 = scalar_lea.hbm %s1152_s5, 32 }
 0x3e1   : > { %p866_p13 = scmp.ne.s32.totalorder %s1152_s5, %s865_s25  ;;  %p871_p2 = scmp.lt.u32.totalorder %s865_s25, %s1152_s5 }
 0x3e3   : > { %p867_p0 = pnand %p866_p13, %p1100_p5 }
 0x3e5   : > { %p868_p1 = pneg %p867_p0 }
 0x3e7   : > { %p873_p3 = pnand %p871_p2, %p868_p1 }
 0x3e9   : > { %876 = shalt.err (!%p873_p3)
}
 0x3ea   : > { %778 = dma.vmem_to_hbm [thread:$0]  (%p1100_p5), %s636_s11, 32, %s1152_s5, [#allocation6]  }
 0x3eb   : > { %906 = dma.done.wait (%p1100_p5), [#allocation6], 32  }
 0x3ec   : > { %908 = vsyncadd (%p1100_p5), [#allocation6], 4294967264 }
 0x3ed PF: > { %s16_s24 = sadd.s32 1, %s935_s24   ;;  %s1156_s18 = smov %s915_s19 }
 0x3ee   : > { %p13_p4 = scmp.ge.s32.totalorder %s16_s24, 5   ;;  %s1157_s19 = smov %s1041_s13 }
 0x3ef   : > { %s1158_s20 = smov %s923_s21  ;;  %s1159_s21 = smov %s1032_s8 }
 0x3f0   : > { %s1160_s22 = smov %s931_s23  ;;  %s1161_s23 = smov %s1163_s26 }
 0x3f1   :  { %15 = sbr.rel (!%p13_p4) target bundleno = 4 (0x4), region = 169 }
 0x3f8   :  { %648 = vsyncpa [#allocation6], 1 }
 0x3f9   :  { %650 = vsyncpa [#allocation6 + $0x1], 1 }

// kernel: tpu_custom_call.1
= control target key start
LH: loop header
LB: loop body
LE: loop exit
PB: predicated region body
PF: predicated region fallthrough
CT: control target
= control target key end

     0   :  { %10 = vsyncpa [#allocation6], 0  ;;  %s975_s18 = smov 0   ;;  %s977_s19 = smov 0   ;;  %s1147_s0 = inlined_call_operand.vmem [shape: f32[2,16,128], index: 0, kind: input, shape index: {}]   ;;  %s1148_s1 = inlined_call_operand.vmem [shape: f32[2,22,128], index: 1, kind: input, shape index: {}]   ;;  %s1149_s2 = inlined_call_operand.vmem [shape: f32[32,32], index: 2, kind: input, shape index: {}]   ;;  %s1150_s3 = inlined_call_operand.vmem [shape: f32[32,128], index: 3, kind: input, shape index: {}]   ;;  %s1151_s4 = inlined_call_operand.vmem [shape: f32[1,128], index: 4, kind: input, shape index: {}]   ;;  %s1152_s5 = inlined_call_operand.hbm [shape: f32[2,128], index: 5, kind: output, shape index: {}]  }
   0x1   :  { %s979_s20 = smov 0   ;;  %s981_s21 = smov 0  }
   0x2   :  { %s983_s22 = smov 0   ;;  %s985_s23 = smov 0  }
   0x3   :  { %s987_s24 = smov 0  }
   0x4 LB: > { %s713_s25 = sadd.s32 4294967295, %s935_s24   ;;  %s25_s26 = sadd.s32 1, %s931_s23  ;;  %s935_s24 = sphi %s987_s24, %s16_s24   ;;  %s931_s23 = sphi %s985_s23, %s1161_s23   ;;  %s927_s22 = sphi %s983_s22, %s1160_s22   ;;  %s923_s21 = sphi %s981_s21, %s1159_s21   ;;  %s919_s20 = sphi %s979_s20, %s1158_s20   ;;  %s915_s19 = sphi %s977_s19, %s1157_s19   ;;  %s911_s18 = sphi %s975_s18, %s1156_s18  }
   0x5   : > { %p26_p0 = scmp.ge.s32.totalorder %s25_s26, 3  ;;  %p32_p1 = scmp.lt.s32.totalorder %s931_s23, 1 }
   0x6   : > { %p48_p2 = scmp.ne.s32.totalorder %s923_s21, %s919_s20  ;;  %p49_p4 = scmp.eq.s32.totalorder %s935_s24, 0 }
   0x7   : > { %s1163_s26 = smov (%p26_p0, %s25_s26), 0  ;;  %p64_p5 = scmp.lt.s32.totalorder %s931_s23, 2 }
   0x8   : > { %s33_s27 = scalar_select %p32_p1, %s931_s23, 1 }
   0x9   : > { %p34_p3 = scmp.lt.s32.totalorder %s1163_s26, 1  ;;  %s41_s29 = sadd.s32 1, %s923_s21 }
   0xa   : > { %p1023_p6 = por %p49_p4, %p48_p2  ;;  %p66_p7 = scmp.lt.s32.totalorder %s1163_s26, 2 }
   0xb   : > { %s35_s28 = scalar_select %p34_p3, %s1163_s26, 1 }
   0xc   : > { %p80_p9 = scmp.ne.s32.totalorder %s915_s19, %s911_s18  ;;  %s73_s12 = sadd.s32 1, %s915_s19 }
   0xd   : > { %s37_s6 = ssub.s32 %s33_s27, %s35_s28  ;;  %p715_p12 = scmp.ge.s32.totalorder %s935_s24, 3 }
   0xe   : > { %p39_p8 = scmp.eq.s32.totalorder %s37_s6, 0  ;;  %p1035_p10 = por %p80_p9, %p49_p4 }
   0xf   : > { %s65_s7 = scalar_select %p64_p5, %s931_s23, 2 }
  0x10   : > { %s1032_s8 = scalar_select %p39_p8, %s923_s21, %s41_s29  }
  0x11   : > { %s67_s9 = scalar_select %p66_p7, %s1163_s26, 2 }
  0x12   : > { %204 = sbr.rel (%p715_p12) target bundleno = 39 (0x27), region = 28 }
  0x13   : > { %s69_s11 = ssub.s32 %s65_s7, %s67_s9 }
  0x14   : > { %p71_p11 = scmp.eq.s32.totalorder %s69_s11, 0 }
  0x16   : > { %s1041_s13 = scalar_select %p71_p11, %s915_s19, %s73_s12  }
  0x19   : > { %207 = sbr.rel (!%p1023_p6) target bundleno = 32 (0x20), region = 32  ;;  %s209_s14 = sand.u32 (%p1023_p6), 1, %s923_s21  }
  0x1a   : > { %s717_s15 = sshll.u32 (%p1023_p6), %s33_s27, 3  ;;  %s716_s16 = sshll.u32 (%p1023_p6), %s209_s14, 4 }
  0x1b   : > { %s218_s29 = scalar_lea.vmem (%p1023_p6), %s1147_s0, %s717_s15  ;;  %s211_s6 = scalar_lea.vmem (%p1023_p6), [#allocation3], %s716_s16 }
  0x1c   : > { %v248_v0 = vld [vmem:[%s218_s29] sm:$0xff] (%p1023_p6)  ;;  %v250_v1 = vld [vmem:[%s218_s29 + $0x10] sm:$0xff] (%p1023_p6) }
  0x1d   : > { %249 = vst [vmem:[%s211_s6] sm:$0xff] (%p1023_p6), %v248_v0  ;;  %251 = vst [vmem:[%s211_s6 + $0x8] sm:$0xff] (%p1023_p6), %v250_v1 }
  0x20 PF: > { %257 = sbr.rel (!%p1035_p10) target bundleno = 39 (0x27), region = 70  ;;  %s259_s30 = sand.u32 (%p1035_p10), 1, %s915_s19  }
  0x21   : > { %s719_s9 = sshll.u32 (%p1035_p10), %s65_s7, 3  ;;  %s718_s11 = sshll.u32 (%p1035_p10), %s259_s30, 4 }
  0x22   : > { %s268_s14 = scalar_lea.vmem (%p1035_p10), %s1148_s1, %s719_s9  ;;  %s261_s15 = scalar_lea.vmem (%p1035_p10), [#allocation4], %s718_s11 }
  0x23   : > { %v298_v2 = vld [vmem:[%s268_s14] sm:$0xff] (%p1035_p10)  ;;  %v300_v3 = vld [vmem:[%s268_s14 + $0x18] sm:$0xff] (%p1035_p10) }
  0x24   : > { %299 = vst [vmem:[%s261_s15] sm:$0xff] (%p1035_p10), %v298_v2  ;;  %301 = vst [vmem:[%s261_s15 + $0x8] sm:$0xff] (%p1035_p10), %v300_v3 }
  0x27 PF: > { %p720_p13 = scmp.ge.s32.totalorder %s935_s24, 1  ;;  %p306_p0 = scmp.lt.s32.totalorder %s935_s24, 4 }
  0x29   : > { %p307_p1 = pnand %p720_p13, %p306_p0 }
  0x2a   : > { %s313_s7 = sand.u32 (!%p307_p1), 1, %s919_s20   ;;  %s320_s10 = sand.u32 (!%p307_p1), 1, %s911_s18  }
  0x2b   : > { %310 = sbr.rel (%p307_p1) target bundleno = 1005 (0x3ed), region = 108  ;;  %s721_s16 = sshll.u32 (!%p307_p1), %s313_s7, 4 }
  0x2c   : > { %s722_s17 = sshll.u32 (!%p307_p1), %s320_s10, 4  ;;  %s315_s28 = scalar_lea.vmem (!%p307_p1), [#allocation3], %s721_s16 }
  0x2d   : > { %s1060_s29 = scalar_lea.vmem (!%p307_p1), [#allocation4], %s722_s17  ;;  %p723_p2 = scmp.ne.s32.totalorder (!%p307_p1), %s927_s22, 0 }
  0x32   : > { %355 = sbr.rel (%p723_p2) target bundleno = 57 (0x39), region = 120  ;;  %v937_v4 = vmov (!%p723_p2), -inf  }
  0x33   : > { %356 = vst [vmem:[#allocation2] sm:$0x3] (!%p723_p2), %v937_v4 }
  0x39 PF: > { %p724_p3 = scmp.ge.s32.totalorder %s927_s22, 2 }
  0x3a   : > { %v362_v5 = vld [vmem:[%s315_s28] sm:$0xff] (!%p724_p3)  ;;  %v363_v6 = vld [vmem:[%s315_s28 + $0x8] sm:$0xff] (!%p724_p3)  ;;  %vm378_vm0 = vcmask (!%p724_p3), 1041409  }
  0x3b   : > { %360 = sbr.rel (%p724_p3) target bundleno = 85 (0x55), region = 124  ;;  %v364_v7 = vrot.slane (!%p724_p3), %v362_v5, 4  ;;  %v370_v8 = vrot.slane (!%p724_p3), %v363_v6, 4  ;;  %v384_v9 = vld [vmem:[%s1060_s29] sm:$0xff] (!%p724_p3)  ;;  %v385_v10 = vld [vmem:[%s1060_s29 + $0x8] sm:$0xff] (!%p724_p3) }
  0x3c   : > { %v386_v11 = vrot.slane (!%p724_p3), %v384_v9, 4  ;;  %v392_v12 = vrot.slane (!%p724_p3), %v385_v10, 4  ;;  %v361_v27 = vld [vmem:[#allocation2] sm:$0x3] (!%p724_p3) }
  0x3d   : > { %v365_v13 = vmax.f32 (!%p724_p3), %v362_v5, %v364_v7  ;;  %v371_v14 = vmax.f32 (!%p724_p3), %v363_v6, %v370_v8 }
  0x3e   : > { %v387_v15 = vmax.f32 (!%p724_p3), %v384_v9, %v386_v11  ;;  %v393_v16 = vmax.f32 (!%p724_p3), %v385_v10, %v392_v12 }
  0x3f   : > { %v366_v17 = vrot.slane (!%p724_p3), %v365_v13, 2  ;;  %v372_v18 = vrot.slane (!%p724_p3), %v371_v14, 2 }
  0x40   : > { %v388_v19 = vrot.slane (!%p724_p3), %v387_v15, 2  ;;  %v394_v20 = vrot.slane (!%p724_p3), %v393_v16, 2 }
  0x41   : > { %v367_v21 = vmax.f32 (!%p724_p3), %v365_v13, %v366_v17  ;;  %v373_v22 = vmax.f32 (!%p724_p3), %v371_v14, %v372_v18 }
  0x42   : > { %v389_v25 = vmax.f32 %v387_v15, %v388_v19  ;;  %v395_v26 = vmax.f32 %v393_v16, %v394_v20 }
  0x43   : > { %v368_v23 = vrot.slane %v367_v21, 1  ;;  %v374_v24 = vrot.slane %v373_v22, 1 }
  0x44   : > { %v390_v31 = vrot.slane %v389_v25, 1  ;;  %v396_v32 = vrot.slane %v395_v26, 1 }
  0x45   : > { %v369_v28 = vmax.f32 %v367_v21, %v368_v23  ;;  %v375_v29 = vmax.f32 %v373_v22, %v374_v24 }
  0x46   : > { %v391_v34 = vmax.f32 %v389_v25, %v390_v31  ;;  %v397_v35 = vmax.f32 %v395_v26, %v396_v32 }
  0x47   : > { %v379_v30 = vsel %vm378_vm0, %v375_v29, %v369_v28 }
  0x48   : > { %v381_v33 = vmax.f32 %v361_v27, %v379_v30  ;;  %v400_v36 = vsel %vm378_vm0, %v397_v35, %v391_v34 }
  0x4a   : > { %382 = vst [vmem:[#allocation2] sm:$0x3] %v381_v33 }
  0x51   : > { %v383_v37 = vld [vmem:[#allocation2] sm:$0x3] }
  0x52   : > { %v402_v38 = vmax.f32 %v383_v37, %v400_v36 }
  0x54   : > { %403 = vst [vmem:[#allocation2] sm:$0x3] %v402_v38 }
  0x55 PF: > { %p725_p4 = scmp.ne.s32.totalorder %s927_s22, 2 }
  0x56   : > { %v408_v39 = vld [vmem:[%s1060_s29] sm:$0x3f] (!%p725_p4)  ;;  %v409_v40 = vld [vmem:[%s1060_s29 + $0x8] sm:$0x3f] (!%p725_p4)  ;;  %vm411_vm1 = vcmask (!%p725_p4), 1045504   ;;  %vm428_vm2 = vcmask (!%p725_p4), 1041409  }
  0x57   : > { %407 = sbr.rel (%p725_p4) target bundleno = 980 (0x3d4), region = 128  ;;  %v412_v41 = vsel (!%p725_p4), %vm411_vm1, %v408_v39, -inf  ;;  %v419_v42 = vsel (!%p725_p4), %vm411_vm1, %v409_v40, -inf  ;;  %v447_v53 = vld [vmem:[%s1149_s2] sm:$0xff] (!%p725_p4)  ;;  %v448_v54 = vld [vmem:[%s1149_s2 + $0x8] sm:$0xff] (!%p725_p4)  ;;  %v938_v59 = vmov (!%p725_p4), 0.0|0.0  }
  0x58   : > { %v413_v43 = vrot.slane (!%p725_p4), %v412_v41, 4  ;;  %v420_v44 = vrot.slane (!%p725_p4), %v419_v42, 4  ;;  %v766_v55 = vpack.c.bf16 (!%p725_p4), %v448_v54, %v447_v53  ;;  %765 = vmatprep.subr.bf16.mxu0 (!%p725_p4), %v938_v59  ;;  %771 = vmatprep.subr.bf16.mxu1 (!%p725_p4), %v938_v59  ;;  %v449_v61 = vld [vmem:[%s1149_s2 + $0x10] sm:$0xff] (!%p725_p4)  ;;  %v450_v62 = vld [vmem:[%s1149_s2 + $0x18] sm:$0xff] (!%p725_p4)  ;;  %vm939_vm3 = vmmov (!%p725_p4), 0   ;;  %s941_s27 = smov (!%p725_p4), 96  }
  0x59   : > { %v769_v0 = vpack.c.bf16 (!%p725_p4), %v450_v62, %v449_v61  ;;  %v940_v1 = vmov (!%p725_p4), 0.0   ;;  %s942_s14 = smov (!%p725_p4), 32   ;;  %s943_s15 = smov (!%p725_p4), 64   ;;  %vm451_vm4 = vcmask (!%p725_p4), 261120   ;;  %vm525_vm5 = vcmask (!%p725_p4), 254976   ;;  %v541_v17 = vld [vmem:[%s1150_s3] sm:$0xff] (!%p725_p4) }
  0x5a   : > { %v414_v45 = vmax.f32 (!%p725_p4), %v412_v41, %v413_v43  ;;  %v421_v46 = vmax.f32 (!%p725_p4), %v419_v42, %v420_v44  ;;  %767 = vmatpush3.bf16.msra.mxu0 (!%p725_p4), %v766_v55  ;;  %751 = vmatprep.mubr.msk.f32.mxu0 (!%p725_p4), %vm939_vm3, %v940_v1  ;;  %v542_v18 = vld [vmem:[%s1150_s3 + $0x8] sm:$0xff] (!%p725_p4)  ;;  %v543_v19 = vld [vmem:[%s1150_s3 + $0x10] sm:$0xff] (!%p725_p4)  ;;  %v544_v21 = vld [vmem:[%s1150_s3 + $0x18] sm:$0xff] (!%p725_p4) }
  0x5b   : > { %v410_v56 = vld [vmem:[#allocation2] sm:$0x3] (!%p725_p4)  ;;  %768 = vmatprep.subr.bf16.mxu0 (!%p725_p4), %v938_v59  ;;  %762 = vmatprep.mubr.msk.f32.mxu1 (!%p725_p4), %vm939_vm3, %v940_v1  ;;  %v772_v20 = vpack.c.bf16 (!%p725_p4), %v542_v18, %v541_v17  ;;  %v775_v22 = vpack.c.bf16 (!%p725_p4), %v544_v21, %v543_v19 }
  0x5c   : > { %v415_v47 = vrot.slane (!%p725_p4), %v414_v45, 2  ;;  %v422_v48 = vrot.slane (!%p725_p4), %v421_v46, 2  ;;  %v727_v29 = vld [vmem:[%s1151_s4] ss:$0 sm:$0xff] (!%p725_p4) }
  0x5d   : > { %773 = vmatpush3.bf16.msra.mxu1 (!%p725_p4), %v772_v20 }
  0x5e   : > { %v416_v49 = vmax.f32 %v414_v45, %v415_v47  ;;  %v423_v50 = vmax.f32 %v421_v46, %v422_v48  ;;  %770 = vmatpush3.bf16.msra.mxu0 %v769_v0  ;;  %774 = vmatprep.subr.bf16.mxu1 %v938_v59 }
  0x60   : > { %v417_v51 = vrot.slane %v416_v49, 1  ;;  %v424_v52 = vrot.slane %v423_v50, 1 }
  0x61   : > { %776 = vmatpush3.bf16.msra.mxu1 %v775_v22 }
  0x62   : > { %v418_v57 = vmax.f32 %v416_v49, %v417_v51  ;;  %v425_v58 = vmax.f32 %v423_v50, %v424_v52 }
  0x64   : > { %v429_v60 = vsel %vm428_vm2, %v425_v58, %v418_v57 }
  0x65   : > { %v431_v63 = vmax.f32 %v410_v56, %v429_v60 }
  0x67   : > { %432 = vst [vmem:[#allocation2] sm:$0x3] %v431_v63 }
  0x6e   : > { %v433_v2 = vld [vmem:[#allocation2] sm:$0x3] }
  0x6f   : > { %435 = vrot.lane.b32.xlu0 %v433_v2, %s941_s27  ;;  %443 = vrot.lane.b32.xlu1 %v433_v2, %s942_s14 }
  0x73   : > { %439 = vrot.lane.b32.xlu0 %v433_v2, %s943_s15 }
  0xe1   : > { %v436_v3 = vpop.permute.xlu0 %435  ;;  %v444_v6 = vpop.permute.xlu1 %443 }
  0xe2   : > { %v438_v4 = vmax.f32 %v433_v2, %v436_v3 }
  0xe5   : > { %v440_v5 = vpop.permute.xlu0 %439 }
  0xe6   : > { %v442_v7 = vmax.f32 %v438_v4, %v440_v5 }
  0xe8   : > { %v446_v8 = vmax.f32 %v442_v7, %v444_v6 }
  0xea   : > { %752 = vmatmul.mubr.msk.f32.vlgmr.msra.gmra.mrb[0].mxu0 %vm451_vm4, %v446_v8 }
 0x1bd   : > { %v521_v9 = vpop.f32.mrb[0].mxu0 }
 0x1be   : > { %v753_v10 = vpop.f32.mrb[1].mxu0  ;;  %v526_v11 = vsel %vm525_vm5, %v521_v9, -inf }
 0x1bf   : > { %527 = vmax.xlane.f32.xlu1 %v526_v11 }
 0x24c   : > { %v528_v12 = vpop.xlane.xlu1 %527 }
 0x24d   : > { %v529_v13 = vsub.f32 %v521_v9, %v528_v12 }
 0x24f   : > { %v530_v14 = vmul.f32 1.442695, %v529_v13 }
 0x251   : > { %847 = vpow2.f32 %v530_v14 }
 0x25b   : > { %v848_v15 = vpop.eup %847 }
 0x25c   : > { %v532_v16 = vsel %vm525_vm5, %v848_v15, 0.0 }
 0x25d   : > { %533 = vadd.xlane.f32.xlu0 %v532_v16 }
 0x2ea   : > { %v534_v23 = vpop.xlane.xlu0 %533 }
 0x2eb   : > { %849 = vrcp.f32 %v534_v23 }
 0x2f5   : > { %v850_v24 = vpop.eup %849 }
 0x2f6   : > { %v536_v25 = vmul.f32 %v850_v24, %v848_v15 }
 0x2f8   : > { %v537_v26 = vmul.f32 %v536_v25, %v446_v8 }
 0x2fa   : > { %vm538_vm6 = vcmp.gt.f32.partialorder %v537_v26, 0.0  ;;  %v539_v27 = vmul.f32 0.2, %v537_v26 }
 0x2fc   : > { %v540_v28 = vsel %vm538_vm6, %v537_v26, %v539_v27 }
 0x2fd   : > { %763 = vmatmul.mubr.msk.f32.vlgmr.msra.gmra.mrb[0].mxu1 %vm451_vm4, %v540_v28 }
 0x3d0   : > { %v621_v30 = vpop.f32.mrb[0].mxu1 }
 0x3d1   : > { %v622_v31 = vadd.f32 %v727_v29, %v621_v30  ;;  %v764_v32 = vpop.f32.mrb[1].mxu1 }
 0x3d3   : > { %625 = vst [vmem:[#allocation5] sm:$0x3] %v622_v31 }
 0x3d4 PF: > { %p1100_p5 = scmp.eq.s32.totalorder %s713_s25, 2  ;;  %s944_s9 = smov [#allocation5]  }
 0x3d5   : > { %s635_s11 = sshll.u32 %s944_s9, 4  ;;  %s636_s11 = int_to_ptr.vmem [resolvable:$true] %s635_s11 }
 0x3d6   : > { %s851_s12 = scalar_lea.vmem %s636_s11, 32  ;;  %p858_p9 = scmp.lt.s32.totalorder %s636_s11, %s636_s11 }
 0x3d7   : > { %p852_p6 = scmp.ne.s32.totalorder %s636_s11, %s851_s12  ;;  %p859_p10 = scmp.lt.s32.totalorder %s851_s12, %s851_s12 }
 0x3d9   : > { %p853_p7 = pnand %p852_p6, %p1100_p5  ;;  %p860_p11 = por %p859_p10, %p858_p9 }
 0x3db   : > { %p854_p8 = pneg %p853_p7 }
 0x3dd   : > { %p861_p12 = pnand %p860_p11, %p854_p8 }
 0x3df   : > { %864 = shalt.err (!%p861_p12)
}
 0x3e0   : > { %s865_s25 = scalar_lea.hbm %s1152_s5, 32 }
 0x3e1   : > { %p866_p13 = scmp.ne.s32.totalorder %s1152_s5, %s865_s25  ;;  %p871_p2 = scmp.lt.u32.totalorder %s865_s25, %s1152_s5 }
 0x3e3   : > { %p867_p0 = pnand %p866_p13, %p1100_p5 }
 0x3e5   : > { %p868_p1 = pneg %p867_p0 }
 0x3e7   : > { %p873_p3 = pnand %p871_p2, %p868_p1 }
 0x3e9   : > { %876 = shalt.err (!%p873_p3)
}
 0x3ea   : > { %778 = dma.vmem_to_hbm [thread:$0]  (%p1100_p5), %s636_s11, 32, %s1152_s5, [#allocation6]  }
 0x3eb   : > { %906 = dma.done.wait (%p1100_p5), [#allocation6], 32  }
 0x3ec   : > { %908 = vsyncadd (%p1100_p5), [#allocation6], 4294967264 }
 0x3ed PF: > { %s16_s24 = sadd.s32 1, %s935_s24   ;;  %s1156_s18 = smov %s915_s19 }
 0x3ee   : > { %p13_p4 = scmp.ge.s32.totalorder %s16_s24, 5   ;;  %s1157_s19 = smov %s1041_s13 }
 0x3ef   : > { %s1158_s20 = smov %s923_s21  ;;  %s1159_s21 = smov %s1032_s8 }
 0x3f0   : > { %s1160_s22 = smov %s931_s23  ;;  %s1161_s23 = smov %s1163_s26 }
 0x3f1   :  { %15 = sbr.rel (!%p13_p4) target bundleno = 4 (0x4), region = 169 }
 0x3f8   :  { %648 = vsyncpa [#allocation6], 1 }
 0x3f9   :  { %650 = vsyncpa [#allocation6 + $0x1], 1 }

</bundles_post_ra>
